<compile_context>
chip_gen: v5e
topology: v5e:2x2
jax: 0.10.0
libtpu: 0.0.40
codegen_flags: <defaults>
</compile_context>

<pallas_src>
import functools

import jax
import jax.numpy as jnp
from jax.experimental import pallas as pl
from jax.experimental.pallas import tpu as pltpu

LANE = 128


def _round_up(x, m):
    return ((x + m - 1) // m) * m


# -----------------------------------------------------------------------------
# Fused kernel: trunk layers + packed 2*Q heads, all from two parameter slabs.
# -----------------------------------------------------------------------------
def _fused_init_kernel(x_ref, w_ref, b_ref, out_ref, *, num_layers, d_in):
    # x_ref:   (B, D0)          activations (D0 may be < Dmax; handled below)
    # w_ref:   (L, Dmax, Dmax)  all weights, zero-padded, layer i at w_ref[i]
    # b_ref:   (L, 1, Dmax)     all biases, zero-padded
    # out_ref: (B, Dmax)        lane-dense output slab (last layer = packed heads)
    h = x_ref[...].astype(jnp.float32)
    for i in range(num_layers):
        if i == 0:
            # Static sub-view: only the first d_in rows of layer-0 weights are
            # real (rest are zero padding) and x has only d_in features.
            w = w_ref[0, :d_in, :]
        else:
            w = w_ref[i]
        # TODO(synk): if params move to bf16, feed bf16 straight to jnp.dot
        # (keep preferred_element_type=f32 and the tanh in f32).
        h = jnp.tanh(
            jnp.dot(h, w.astype(jnp.float32), preferred_element_type=jnp.float32)
            + b_ref[i].astype(jnp.float32)
        )
    out_ref[...] = h.astype(out_ref.dtype)


# -----------------------------------------------------------------------------
# Parameter construction (mimics nn.Linear default init)
# -----------------------------------------------------------------------------
def init_params(key, hidden_sizes, output_size, rnn_stack_size, dtype=jnp.float32):
    params = {"hidden_w": [], "hidden_b": []}
    keys = jax.random.split(key, 2 * (len(hidden_sizes) - 1) + 4)
    k_idx = 0
    for i in range(len(hidden_sizes) - 1):
        fan_in = hidden_sizes[i]
        bound = 1.0 / jnp.sqrt(fan_in)
        w = jax.random.uniform(keys[k_idx], (hidden_sizes[i], hidden_sizes[i + 1]),
                               dtype, -bound, bound)
        b = jax.random.uniform(keys[k_idx + 1], (1, hidden_sizes[i + 1]),
                               dtype, -bound, bound)
        k_idx += 2
        params["hidden_w"].append(w)
        params["hidden_b"].append(b)

    H = hidden_sizes[-1]
    bound = 1.0 / jnp.sqrt(H)
    Q = rnn_stack_size
    params["Wc"] = jax.random.uniform(keys[k_idx + 0], (Q, H, output_size), dtype, -bound, bound)
    params["bc"] = jax.random.uniform(keys[k_idx + 1], (Q, output_size), dtype, -bound, bound)
    params["Wh"] = jax.random.uniform(keys[k_idx + 2], (Q, H, output_size), dtype, -bound, bound)
    params["bh"] = jax.random.uniform(keys[k_idx + 3], (Q, output_size), dtype, -bound, bound)
    return params


def prepare_params(params):
    """Pack ALL weights/biases into two zero-padded slabs (one DMA each).

    Layer list = trunk Linears followed by one packed "head layer" holding all
    2*Q output heads column-wise (c block then h block, column = q*O + o).
    Every weight is zero-padded to (Dmax, Dmax) and every bias to (1, Dmax),
    Dmax a multiple of 128 lanes. tanh(0)=0 + zero rows/cols keep padded lanes
    exactly zero, so results are unchanged and padded lanes are simply sliced
    off after the call.
    """
    Ws = list(params["hidden_w"])
    bs = [jnp.reshape(b, (1, -1)) for b in params["hidden_b"]]

    Wc, bc, Wh, bh = params["Wc"], params["bc"], params["Wh"], params["bh"]
    Q, H, O = Wc.shape
    w_c = jnp.transpose(Wc, (1, 0, 2)).reshape(H, Q * O)
    w_h = jnp.transpose(Wh, (1, 0, 2)).reshape(H, Q * O)
    Ws.append(jnp.concatenate([w_c, w_h], axis=1))                     # (H, 2*Q*O)
    bs.append(jnp.concatenate([bc.reshape(1, Q * O),
                               bh.reshape(1, Q * O)], axis=1))         # (1, 2*Q*O)

    dims = [Ws[0].shape[0]] + [w.shape[1] for w in Ws]
    dmax = max(_round_up(d, LANE) for d in dims)

    num_layers = len(Ws)
    dtype = Ws[0].dtype
    w_slab = jnp.zeros((num_layers, dmax, dmax), dtype)
    b_slab = jnp.zeros((num_layers, 1, dmax), dtype)
    for i, (w, b) in enumerate(zip(Ws, bs)):
        w_slab = w_slab.at[i, : w.shape[0], : w.shape[1]].set(w)
        b_slab = b_slab.at[i, 0, : b.shape[1]].set(b[0])

    out = dict(params)
    out["W_slab"] = w_slab
    out["b_slab"] = b_slab
    return out


# -----------------------------------------------------------------------------
# Forward: one pallas_call, whole-array VMEM blocks (tiny operands, no grid)
# -----------------------------------------------------------------------------
def init_module_forward(params, flattened_a):
    """Returns (c_out, h_out), each (B, Q, output_size), batch-leading.

    c_out[:, q] / h_out[:, q] equal the PyTorch module's c_outputs[q] /
    h_outputs[q]; keeping B leading avoids a host-side transpose copy.
    """
    w_slab, b_slab = params["W_slab"], params["b_slab"]
    Q, _, O = params["Wc"].shape
    B, D0 = flattened_a.shape
    L, Dmax, _ = w_slab.shape

    flops = 2 * B * (D0 * Dmax + (L - 1) * Dmax * Dmax) + B * Dmax * L
    transcendentals = B * Dmax * L
    bytes_accessed = 4 * (flattened_a.size + w_slab.size + b_slab.size + B * Dmax)

    # No grid: three tiny operands, everything fits in VMEM, single launch.
    # TODO(synk): if batch/hidden grow, add a batch grid ("parallel" for the
    #   2 TCs on v7x), ~512-row tiles, resident-weight index_maps, and
    #   pltpu.CompilerParams(vmem_limit_bytes=...) sized for v7x's 64 MiB VMEM.
    slab = pl.pallas_call(
        functools.partial(_fused_init_kernel, num_layers=L, d_in=D0),
        out_shape=jax.ShapeDtypeStruct((B, Dmax), flattened_a.dtype),
        in_specs=[pl.BlockSpec(memory_space=pltpu.MemorySpace.VMEM)] * 3,
        out_specs=pl.BlockSpec(memory_space=pltpu.MemorySpace.VMEM),
        cost_estimate=pl.CostEstimate(flops=flops,
                                      transcendentals=transcendentals,
                                      bytes_accessed=bytes_accessed),
    )(flattened_a, w_slab, b_slab)

    # Slice + reshape only (views / cheap); no transpose copy.
    r = slab[:, : 2 * Q * O].reshape(B, 2, Q, O)
    c_out = r[:, 0]   # (B, Q, O)
    h_out = r[:, 1]   # (B, Q, O)
    return c_out, h_out


# -----------------------------------------------------------------------------
# Pure-JAX reference (same (B, Q, O) layout) for a sanity check
# -----------------------------------------------------------------------------
def reference_forward(params, x):
    h = x
    for w, b in zip(params["hidden_w"], params["hidden_b"]):
        h = jnp.tanh(jnp.dot(h, w, precision=jax.lax.Precision.HIGHEST) + b)
    c = jnp.tanh(jnp.einsum("bh,qho->bqo", h, params["Wc"],
                            precision=jax.lax.Precision.HIGHEST)
                 + params["bc"][None])
    hh = jnp.tanh(jnp.einsum("bh,qho->bqo", h, params["Wh"],
                             precision=jax.lax.Precision.HIGHEST)
                  + params["bh"][None])
    return c, hh


if __name__ == "__main__":
    # Small MLPSpecs: hidden_sizes=[32, 64, 64], output_size=16, tanh acts.
    hidden_sizes = [32, 64, 64]
    output_size = 16
    rnn_stack_size = 3   # Q
    batch = 8

    key = jax.random.PRNGKey(0)
    k_params, k_x = jax.random.split(key)
    params = prepare_params(init_params(k_params, hidden_sizes, output_size, rnn_stack_size))
    flattened_a = jax.random.normal(k_x, (batch, hidden_sizes[0]), jnp.float32)

    fwd = jax.jit(init_module_forward)
    c_out, h_out = fwd(params, flattened_a)
    jax.block_until_ready((c_out, h_out))

    # Sanity check against a pure-JAX reference.
    c_ref, h_ref = reference_forward(params, flattened_a)
    assert c_out.shape == (batch, rnn_stack_size, output_size)
    assert h_out.shape == (batch, rnn_stack_size, output_size)
    assert jnp.allclose(c_out, c_ref, atol=2e-3, rtol=2e-3)
    assert jnp.allclose(h_out, h_ref, atol=2e-3, rtol=2e-3)

    print("KERNEL_OK")
</pallas_src>

<mosaic_0001>
module attributes {stable_mosaic.version = 11 : i64} {
  func.func @_fused_init_kernel(%arg0: memref<8x32xf32, #tpu.memory_space<vmem>>, %arg1: memref<3x128x128xf32, #tpu.memory_space<vmem>>, %arg2: memref<3x1x128xf32, #tpu.memory_space<vmem>>, %arg3: memref<8x128xf32, #tpu.memory_space<vmem>>) attributes {dimension_semantics = [], scalar_prefetch = 0 : i64, scratch_operands = 0 : i64, tpu.core_type = #tpu.core_type<tc>} {
    %c0 = arith.constant 0 : index
    %c0_0 = arith.constant 0 : index
    %0 = vector.load %arg0[%c0, %c0_0] : memref<8x32xf32, #tpu.memory_space<vmem>>, vector<8x32xf32>
    %c0_1 = arith.constant 0 : index
    %c0_2 = arith.constant 0 : index
    %c0_3 = arith.constant 0 : index
    %1 = vector.load %arg1[%c0_1, %c0_2, %c0_3] : memref<3x128x128xf32, #tpu.memory_space<vmem>>, vector<1x32x128xf32>
    %2 = vector.shape_cast %1 : vector<1x32x128xf32> to vector<32x128xf32>
    %cst = arith.constant dense<0.000000e+00> : vector<8x128xf32>
    %3 = tpu.matmul %0, %2, %cst {dimension_numbers = #tpu.dot_dimension_numbers<[1], [0], [0], [1], [0, 0, 1, 1], [], []>} : vector<8x32xf32>, vector<32x128xf32>, vector<8x128xf32> -> vector<8x128xf32>
    %c0_4 = arith.constant 0 : index
    %c0_5 = arith.constant 0 : index
    %c0_6 = arith.constant 0 : index
    %4 = vector.load %arg2[%c0_4, %c0_5, %c0_6] : memref<3x1x128xf32, #tpu.memory_space<vmem>>, vector<1x1x128xf32>
    %5 = vector.shape_cast %4 : vector<1x1x128xf32> to vector<1x128xf32>
    %6 = vector.broadcast %5 : vector<1x128xf32> to vector<8x128xf32>
    %7 = arith.addf %3, %6 : vector<8x128xf32>
    %8 = math.tanh %7 : vector<8x128xf32>
    %c1 = arith.constant 1 : index
    %c0_7 = arith.constant 0 : index
    %c0_8 = arith.constant 0 : index
    %9 = vector.load %arg1[%c1, %c0_7, %c0_8] : memref<3x128x128xf32, #tpu.memory_space<vmem>>, vector<1x128x128xf32>
    %10 = vector.shape_cast %9 : vector<1x128x128xf32> to vector<128x128xf32>
    %cst_9 = arith.constant dense<0.000000e+00> : vector<8x128xf32>
    %11 = tpu.matmul %8, %10, %cst_9 {dimension_numbers = #tpu.dot_dimension_numbers<[1], [0], [0], [1], [0, 0, 1, 1], [], []>} : vector<8x128xf32>, vector<128x128xf32>, vector<8x128xf32> -> vector<8x128xf32>
    %c1_10 = arith.constant 1 : index
    %c0_11 = arith.constant 0 : index
    %c0_12 = arith.constant 0 : index
    %12 = vector.load %arg2[%c1_10, %c0_11, %c0_12] : memref<3x1x128xf32, #tpu.memory_space<vmem>>, vector<1x1x128xf32>
    %13 = vector.shape_cast %12 : vector<1x1x128xf32> to vector<1x128xf32>
    %14 = vector.broadcast %13 : vector<1x128xf32> to vector<8x128xf32>
    %15 = arith.addf %11, %14 : vector<8x128xf32>
    %16 = math.tanh %15 : vector<8x128xf32>
    %c2 = arith.constant 2 : index
    %c0_13 = arith.constant 0 : index
    %c0_14 = arith.constant 0 : index
    %17 = vector.load %arg1[%c2, %c0_13, %c0_14] : memref<3x128x128xf32, #tpu.memory_space<vmem>>, vector<1x128x128xf32>
    %18 = vector.shape_cast %17 : vector<1x128x128xf32> to vector<128x128xf32>
    %cst_15 = arith.constant dense<0.000000e+00> : vector<8x128xf32>
    %19 = tpu.matmul %16, %18, %cst_15 {dimension_numbers = #tpu.dot_dimension_numbers<[1], [0], [0], [1], [0, 0, 1, 1], [], []>} : vector<8x128xf32>, vector<128x128xf32>, vector<8x128xf32> -> vector<8x128xf32>
    %c2_16 = arith.constant 2 : index
    %c0_17 = arith.constant 0 : index
    %c0_18 = arith.constant 0 : index
    %20 = vector.load %arg2[%c2_16, %c0_17, %c0_18] : memref<3x1x128xf32, #tpu.memory_space<vmem>>, vector<1x1x128xf32>
    %21 = vector.shape_cast %20 : vector<1x1x128xf32> to vector<1x128xf32>
    %22 = vector.broadcast %21 : vector<1x128xf32> to vector<8x128xf32>
    %23 = arith.addf %19, %22 : vector<8x128xf32>
    %24 = math.tanh %23 : vector<8x128xf32>
    %c0_19 = arith.constant 0 : index
    %c0_20 = arith.constant 0 : index
    %25 = vector.load %arg3[%c0_19, %c0_20] : memref<8x128xf32, #tpu.memory_space<vmem>>, vector<8x128xf32>
    tpu.vector_store %arg3[%c0_19, %c0_20], %24 {strides = array<i32>} : memref<8x128xf32, #tpu.memory_space<vmem>>, vector<8x128xf32>,
    return
  }
}

</mosaic_0001>

<bundles_post_ra>
// kernel: init_module_forward.1
= control target key start
LH: loop header
LB: loop body
LE: loop exit
PB: predicated region body
PF: predicated region fallthrough
CT: control target
= control target key end

     0   :  { %8 = vsyncpa [#allocation3], 0  ;;  %s318_s0 = inlined_call_operand.hbm [shape: f32[8,32], index: 0, kind: input, shape index: {}]   ;;  %s319_s1 = inlined_call_operand.hbm [shape: f32[3,128,128], index: 1, kind: input, shape index: {}]   ;;  %s320_s2 = inlined_call_operand.hbm [shape: f32[3,1,128], index: 2, kind: input, shape index: {}]   ;;  %s321_s3 = inlined_call_operand.vmem [shape: f32[8,128], index: 3, kind: output, shape index: {}]  }
   0x1   :  { %9 = vsyncpa [#allocation5], 0  ;;  %s25_s14 = sshll.u32 %s319_s1, 4  ;;  %s279_s15 = smov [#allocation4]   ;;  %s26_s14 = int_to_ptr.hbm [resolvable:$true] %s25_s14 }
   0x2   :  { %s27_s16 = sshll.u32 %s279_s15, 4  ;;  %s15_s19 = sshll.u32 %s318_s0, 4  ;;  %s28_s16 = int_to_ptr.vmem [resolvable:$true] %s27_s16  ;;  %s16_s19 = int_to_ptr.hbm [resolvable:$true] %s15_s19 }
   0x3   :  { %s280_s20 = smov 128   ;;  %s281_s21 = smov 8  }
   0x4   :  { %33 = dma.hbm_to_vmem [thread:$0]  %s26_s14, 6144, %s28_s16, [#allocation5], %s280_s20, %s280_s20, %s281_s21  }
   0x5   :  { %s282_s22 = smov [#allocation2]   ;;  %s38_s26 = sshll.u32 %s320_s2, 4  ;;  %s39_s26 = int_to_ptr.hbm [resolvable:$true] %s38_s26 }
   0x6   :  { %s17_s23 = sshll.u32 %s282_s22, 4  ;;  %s283_s1 = smov [#allocation6]   ;;  %s18_s23 = int_to_ptr.vmem [resolvable:$true] %s17_s23 }
   0x7   :  { %20 = dma.hbm_to_vmem [thread:$0]  %s16_s19, 128, %s18_s23, [#allocation3]  }
   0x8   :  { %s40_s27 = sshll.u32 %s283_s1, 4  ;;  %s284_s28 = smov 16   ;;  %s41_s27 = int_to_ptr.vmem [resolvable:$true] %s40_s27 }
   0x9   :  { %s285_s29 = smov 1  }
   0xa   :  { %46 = dma.hbm_to_vmem [thread:$0]  %s39_s26, 48, %s41_s27, [#allocation5], %s284_s28, %s284_s28, %s285_s29  }
   0xb   :  { %275 = dma.done.wait [#allocation3], 128  }
   0xc   :  { %276 = vsyncadd [#allocation3], 4294967168 }
   0xd   :  { %277 = dma.done.wait [#allocation5], 6192  }
   0xe   :  { %278 = vsyncadd [#allocation5], 4294961104  ;;  %v63_v0 = vld [vmem:[#allocation4 + $0x18] sm:$0xff]  ;;  %v62_v1 = vld [vmem:[#allocation4 + $0x10] sm:$0xff]  ;;  %vm68_vm0 = vcmask 261120  }
   0xf   :  { %84 = vmatpush.msra.mxu0 %v63_v0  ;;  %v109_v2 = vld [vmem:[#allocation4 + $0xf8] sm:$0xff]  ;;  %v61_v3 = vld [vmem:[#allocation4 + $0x8] sm:$0xff]  ;;  %v108_v4 = vld [vmem:[#allocation4 + $0xf0] sm:$0xff] }
  0x10   :  { %115 = vmatpush.msra.mxu1 %v109_v2  ;;  %v107_v5 = vld [vmem:[#allocation4 + $0xe8] sm:$0xff]  ;;  %v60_v6 = vld [vmem:[#allocation4] sm:$0xff]  ;;  %v59_v7 = vld [vmem:[#allocation2] sm:$0xff] }
  0x11   :  { %85 = vmatpush.msra.mxu0 %v62_v1  ;;  %v106_v8 = vld [vmem:[#allocation4 + $0xe0] sm:$0xff]  ;;  %v105_v9 = vld [vmem:[#allocation4 + $0xd8] sm:$0xff]  ;;  %v104_v10 = vld [vmem:[#allocation4 + $0xd0] sm:$0xff] }
  0x12   :  { %116 = vmatpush.msra.mxu1 %v108_v4  ;;  %v103_v11 = vld [vmem:[#allocation4 + $0xc8] sm:$0xff]  ;;  %v102_v12 = vld [vmem:[#allocation4 + $0xc0] sm:$0xff]  ;;  %v101_v13 = vld [vmem:[#allocation4 + $0xb8] sm:$0xff] }
  0x13   :  { %86 = vmatpush.msra.mxu0 %v61_v3  ;;  %v100_v14 = vld [vmem:[#allocation4 + $0xb0] sm:$0xff]  ;;  %v99_v15 = vld [vmem:[#allocation4 + $0xa8] sm:$0xff]  ;;  %v98_v16 = vld [vmem:[#allocation4 + $0xa0] sm:$0xff] }
  0x14   :  { %117 = vmatpush.msra.mxu1 %v107_v5  ;;  %v97_v17 = vld [vmem:[#allocation4 + $0x98] sm:$0xff]  ;;  %v96_v18 = vld [vmem:[#allocation4 + $0x90] sm:$0xff]  ;;  %v95_v19 = vld [vmem:[#allocation4 + $0x88] sm:$0xff] }
  0x15   :  { %87 = vmatpush.msra.mxu0 %v60_v6  ;;  %v94_v20 = vld [vmem:[#allocation4 + $0x80] sm:$0xff]  ;;  %v152_v21 = vld [vmem:[#allocation4 + $0x178] sm:$0xff]  ;;  %v151_v22 = vld [vmem:[#allocation4 + $0x170] sm:$0xff] }
  0x16   :  { %186 = vmatmul.msk.f32.vlgmr.msra.gmra.mxu0 %vm68_vm0, %v59_v7  ;;  %118 = vmatpush.msra.mxu1 %v106_v8  ;;  %v150_v23 = vld [vmem:[#allocation4 + $0x168] sm:$0xff]  ;;  %v149_v24 = vld [vmem:[#allocation4 + $0x160] sm:$0xff]  ;;  %v148_v25 = vld [vmem:[#allocation4 + $0x158] sm:$0xff] }
  0x17   :  { %158 = vmatpush.msra.mxu2 %v152_v21  ;;  %v147_v26 = vld [vmem:[#allocation4 + $0x150] sm:$0xff]  ;;  %v146_v27 = vld [vmem:[#allocation4 + $0x148] sm:$0xff]  ;;  %v145_v28 = vld [vmem:[#allocation4 + $0x140] sm:$0xff] }
  0x18   :  { %119 = vmatpush.msra.mxu1 %v105_v9  ;;  %v144_v29 = vld [vmem:[#allocation4 + $0x138] sm:$0xff]  ;;  %v143_v30 = vld [vmem:[#allocation4 + $0x130] sm:$0xff]  ;;  %v142_v31 = vld [vmem:[#allocation4 + $0x128] sm:$0xff] }
  0x19   :  { %159 = vmatpush.msra.mxu2 %v151_v22  ;;  %v194_v32 = vld [vmem:[#allocation6] ss:$0 sm:$0xff]  ;;  %v140_v37 = vld [vmem:[#allocation4 + $0x118] sm:$0xff]  ;;  %v139_v38 = vld [vmem:[#allocation4 + $0x110] sm:$0xff] }
  0x1a   :  { %120 = vmatpush.msra.mxu1 %v104_v10  ;;  %v141_v36 = vld [vmem:[#allocation4 + $0x120] sm:$0xff]  ;;  %v138_v39 = vld [vmem:[#allocation4 + $0x108] sm:$0xff] }
  0x1b   :  { %160 = vmatpush.msra.mxu2 %v150_v23  ;;  %v137_v40 = vld [vmem:[#allocation4 + $0x100] sm:$0xff] }
  0x1c   :  { %121 = vmatpush.msra.mxu1 %v103_v11  ;;  %v195_v41 = vld [vmem:[#allocation6 + $0x1] ss:$0 sm:$0xff]  ;;  %v196_v45 = vld [vmem:[#allocation6 + $0x2] ss:$0 sm:$0xff] }
  0x1d   :  { %161 = vmatpush.msra.mxu2 %v149_v24 }
  0x1e   :  { %122 = vmatpush.msra.mxu1 %v102_v12 }
  0x1f   :  { %162 = vmatpush.msra.mxu2 %v148_v25 }
  0x20   :  { %123 = vmatpush.msra.mxu1 %v101_v13 }
  0x21   :  { %163 = vmatpush.msra.mxu2 %v147_v26 }
  0x22   :  { %124 = vmatpush.msra.mxu1 %v100_v14 }
  0x23   :  { %164 = vmatpush.msra.mxu2 %v146_v27 }
  0x24   :  { %125 = vmatpush.msra.mxu1 %v99_v15 }
  0x25   :  { %165 = vmatpush.msra.mxu2 %v145_v28 }
  0x26   :  { %126 = vmatpush.msra.mxu1 %v98_v16 }
  0x27   :  { %166 = vmatpush.msra.mxu2 %v144_v29 }
  0x28   :  { %127 = vmatpush.msra.mxu1 %v97_v17 }
  0x29   :  { %167 = vmatpush.msra.mxu2 %v143_v30 }
  0x2a   :  { %128 = vmatpush.msra.mxu1 %v96_v18 }
  0x2b   :  { %168 = vmatpush.msra.mxu2 %v142_v31 }
  0x2c   :  { %129 = vmatpush.msra.mxu1 %v95_v19 }
  0x2d   :  { %169 = vmatpush.msra.mxu2 %v141_v36 }
  0x2e   :  { %130 = vmatpush.msra.mxu1 %v94_v20 }
  0x2f   :  { %170 = vmatpush.msra.mxu2 %v140_v37 }
  0x31   :  { %171 = vmatpush.msra.mxu2 %v139_v38 }
  0x33   :  { %172 = vmatpush.msra.mxu2 %v138_v39 }
  0x35   :  { %173 = vmatpush.msra.mxu2 %v137_v40 }
  0x93   :  { %v89_v33 = vpop.f32.mrf.mxu0 }
  0x94   :  { %v90_v34 = vadd.f32 %v194_v32, %v89_v33 }
  0x96   :  { %197 = vtanh.f32 %v90_v34 }
  0x9c   :  { %v198_v35 = vpop.eup %197 }
  0x9d   :  { %131 = vmatmul.f32.vlgmr.msra.gmra.mxu1 %v198_v35 }
 0x11a   :  { %v132_v42 = vpop.f32.mrf.mxu1 }
 0x11b   :  { %v133_v43 = vadd.f32 %v195_v41, %v132_v42 }
 0x11d   :  { %199 = vtanh.f32 %v133_v43 }
 0x123   :  { %v200_v44 = vpop.eup %199 }
 0x124   :  { %174 = vmatmul.f32.vlgmr.msra.gmra.mxu2 %v200_v44 }
 0x1a7   :  { %v175_v46 = vpop.f32.mrf.mxu2 }
 0x1a8   :  { %v176_v47 = vadd.f32 %v196_v45, %v175_v46 }
 0x1aa   :  { %201 = vtanh.f32 %v176_v47 }
 0x1b0   :  { %v202_v48 = vpop.eup %201 }
 0x1b1   :  { %179 = vst [vmem:[%s321_s3] sm:$0xff] %v202_v48 }
 0x1b2   :  { %184 = vsyncpa [#allocation3], 1 }
 0x1b3   :  { %185 = vsyncpa [#allocation5], 1 }

</bundles_post_ra>
